<compile_context>
chip_gen: v5e
topology: v5e:2x2
jax: 0.10.0
libtpu: 0.0.40
codegen_flags: <defaults>
</compile_context>

<pallas_src>
import functools

import jax
import jax.numpy as jnp
from jax.experimental import pallas as pl
from jax.experimental.pallas import tpu as pltpu


def _cdiv(a, b):
    return -(-a // b)


def _round_up(a, m):
    return _cdiv(a, m) * m


def _default_vmem_budget():
    """Generation-aware budget for the streaming input tiles.

    v7x has only 64 MiB VMEM per TensorCore (vs 128 MiB on v5e/v6e), so derive
    the budget from the actual capacity when it can be queried; otherwise fall
    back to a portable 40 MiB.
    """
    try:
        cap = getattr(pltpu.get_tpu_info(), "vmem_capacity_bytes", None)
        if cap:
            return int(min(48 << 20, cap * 6 // 10))
    except Exception:
        pass
    return 40 << 20


def _vmem_limit(footprint_bytes):
    # Actual footprint + 25% + 2 MiB headroom, floored at a sane scoped limit.
    return int(max(16 << 20, min(1.25 * footprint_bytes + (2 << 20), 128 << 20)))


# ----------------------------------------------------------------------------
# Main kernel: B >= 2 (or B == 1 with tiny HW).  grid = (B tiles, HW tiles).
# ----------------------------------------------------------------------------
def _channel_attention_kernel(x_ref, w1t_ref, b1_ref, w2t_ref, b2_ref,
                              o_ref, max_acc, sum_acc,
                              *, hw_total, hw_tile, tail_len):
    """grid = (B tiles [parallel], HW tiles [arbitrary reduction])."""
    j = pl.program_id(1)
    nj = pl.num_programs(1)

    @pl.when(j == 0)
    def _init():
        max_acc[...] = jnp.full(max_acc.shape, -jnp.inf, dtype=max_acc.dtype)
        sum_acc[...] = jnp.zeros(sum_acc.shape, dtype=sum_acc.dtype)

    # Reductions in f32 for portability (v5e has no bf16 VPU); on v6e/v7x the
    # max path could stay in bf16 for bf16 inputs (not done here).
    x = x_ref[...].astype(jnp.float32)                    # (b_tile, C, hw_tile)

    def _accumulate(x_for_max, x_for_sum):
        max_acc[...] = jnp.maximum(max_acc[...], jnp.max(x_for_max, axis=-1))
        sum_acc[...] = sum_acc[...] + jnp.sum(x_for_sum, axis=-1)

    if tail_len == hw_tile:
        # No HW padding anywhere: plain 2-VPU-op/element stream on every tile.
        _accumulate(x, x)
    else:
        # Only the LAST HW tile carries padded lanes -> mask only there.
        @pl.when(j != nj - 1)
        def _bulk():
            _accumulate(x, x)

        @pl.when(j == nj - 1)
        def _tail():
            lane = jax.lax.broadcasted_iota(jnp.int32, (1, 1, hw_tile), 2)
            valid = lane < tail_len                       # static (1,1,hw_tile)
            _accumulate(jnp.where(valid, x, -jnp.inf),
                        jnp.where(valid, x, 0.0))

    @pl.when(j == nj - 1)
    def _finalize():
        max_p = max_acc[...]                                   # (b_tile, C)
        avg_p = sum_acc[...] * jnp.float32(1.0 / hw_total)     # exact mean
        # Fuse the two MLP passes (max path + avg path) into one matmul.
        v = jnp.concatenate([max_p, avg_p], axis=0)            # (2*b_tile, C)
        h = jnp.dot(v, w1t_ref[...], preferred_element_type=jnp.float32)
        h = jnp.maximum(h + b1_ref[...], 0.0)                  # ReLU
        y = jnp.dot(h, w2t_ref[...], preferred_element_type=jnp.float32)
        y = y + b2_ref[...]                                    # (2*b_tile, C)
        bt = max_p.shape[0]
        scale = jax.nn.sigmoid(y[:bt, :] + y[bt:, :])          # (b_tile, C)
        o_ref[...] = scale[:, None, :].astype(o_ref.dtype)     # (b_tile, 1, C)


def _b_tile_candidates(B, cap=8):
    # Divisors of B (<= cap), largest first, preferring choices that yield
    # >= 2 B-tiles so the "parallel" grid axis can shard across both v7x TCs.
    divs = [d for d in range(min(B, cap), 0, -1) if B % d == 0]
    pref = [d for d in divs if B // d >= 2]
    return pref or divs or [1]


def _tile_sizes(B, C, HW, itemsize, vmem_budget_bytes):
    hw_padded = _round_up(HW, 128)

    def budget_hw(bt):
        # Largest lane-dense HW tile whose double-buffered input fits budget.
        return (vmem_budget_bytes // (2 * bt * C * itemsize) // 128) * 128

    cands = _b_tile_candidates(B)
    b_idx = 0
    b_tile = cands[b_idx]
    # Large C: shrink b_tile before hw_tile so strided-DMA rows stay long
    # (>= 512 f32 lanes keeps each row copy near streaming rate on v5e).
    while b_idx + 1 < len(cands) and budget_hw(b_tile) < min(512, hw_padded):
        b_idx += 1
        b_tile = cands[b_idx]

    # NOTE: the 128-lane floor may slightly overshoot a tiny budget for huge C;
    # one lane-dense tile is the minimum DMA unit, so that is intentional.
    hw_tile = max(128, min(hw_padded, budget_hw(b_tile), 4096))

    # Keep a few pipeline steps in flight when the whole sweep would be only
    # 1-2 grid steps (otherwise prologue DMA / epilogue compute are exposed).
    if (B // b_tile) * _cdiv(HW, hw_tile) <= 2 and hw_tile > 512:
        hw_tile = min(hw_tile, max(512, _round_up(_cdiv(hw_padded, 4), 128)))
    return b_tile, hw_tile


def _pooled_scale(x_flat, w1, b1, w2, b2, vmem_budget_bytes):
    """x_flat: (B, C, HW) -> sigmoid(MLP(maxpool) + MLP(avgpool)), shape (B, C)."""
    B, C, HW = x_flat.shape
    hidden = w1.shape[0]
    itemsize = jnp.dtype(x_flat.dtype).itemsize

    b_tile, hw_tile = _tile_sizes(B, C, HW, itemsize, vmem_budget_bytes)
    assert B % b_tile == 0
    grid = (B // b_tile, _cdiv(HW, hw_tile))
    tail_len = HW - (grid[1] - 1) * hw_tile        # == hw_tile iff no padding

    # Pre-transposed / reshaped params (no in-kernel transpose).
    w1t = jnp.transpose(w1).astype(jnp.float32)    # (C, hidden)
    w2t = jnp.transpose(w2).astype(jnp.float32)    # (hidden, C)
    b1_2d = b1.reshape(1, hidden).astype(jnp.float32)
    b2_2d = b2.reshape(1, C).astype(jnp.float32)

    footprint = (2 * b_tile * C * hw_tile * itemsize      # x, double-buffered
                 + 2 * b_tile * C * itemsize              # output, double-buffered
                 + 2 * 4 * (2 * C * hidden + hidden + C)  # resident weights
                 + 2 * 4 * b_tile * C)                    # accumulators

    kernel = functools.partial(_channel_attention_kernel,
                               hw_total=HW, hw_tile=hw_tile, tail_len=tail_len)

    out = pl.pallas_call(
        kernel,
        out_shape=jax.ShapeDtypeStruct((B, 1, C), x_flat.dtype),
        grid_spec=pltpu.PrefetchScalarGridSpec(
            num_scalar_prefetch=0,
            grid=grid,
            in_specs=[
                # x tile: HW (lane-dense, 128-multiple) is the reduction axis.
                pl.BlockSpec((b_tile, C, hw_tile), lambda i, j: (i, 0, j)),
                # Weights/biases: constant block index -> VMEM-resident.
                pl.BlockSpec((C, hidden), lambda i, j: (0, 0)),
                pl.BlockSpec((1, hidden), lambda i, j: (0, 0)),
                pl.BlockSpec((hidden, C), lambda i, j: (0, 0)),
                pl.BlockSpec((1, C), lambda i, j: (0, 0)),
            ],
            # Same output block across the HW axis => accumulator-style output.
            out_specs=pl.BlockSpec((b_tile, 1, C), lambda i, j: (i, 0, 0)),
            scratch_shapes=[pltpu.VMEM((b_tile, C), jnp.float32),   # running max
                            pltpu.VMEM((b_tile, C), jnp.float32)],  # running sum
        ),
        compiler_params=pltpu.CompilerParams(
            dimension_semantics=("parallel", "arbitrary"),
            vmem_limit_bytes=_vmem_limit(footprint),
        ),
    )(x_flat, w1t, b1_2d, w2t, b2_2d)
    return out.reshape(B, C)


# ----------------------------------------------------------------------------
# B == 1 path: split the HW sweep into two parallel halves (v7x dual-TC).
# ----------------------------------------------------------------------------
def _partial_pool_kernel(x_ref, max_ref, sum_ref, max_acc, sum_acc,
                         *, hw_tile, tail_len, has_dup):
    """grid = (HW split [parallel, one per TensorCore], HW tiles [arbitrary])."""
    s = pl.program_id(0)
    j = pl.program_id(1)
    nj = pl.num_programs(1)

    @pl.when(j == 0)
    def _init():
        max_acc[...] = jnp.full(max_acc.shape, -jnp.inf, dtype=max_acc.dtype)
        sum_acc[...] = jnp.zeros(sum_acc.shape, dtype=sum_acc.dtype)

    x = x_ref[...].astype(jnp.float32)                     # (C, hw_tile)

    def _accumulate(x_for_max, x_for_sum):
        max_acc[...] = jnp.maximum(max_acc[...],
                                   jnp.max(x_for_max, axis=-1, keepdims=True))
        sum_acc[...] = sum_acc[...] + jnp.sum(x_for_sum, axis=-1, keepdims=True)

    has_tail = tail_len < hw_tile
    if not has_tail and not has_dup:
        _accumulate(x, x)
    else:
        # Global padded tail tile = last tile of the last split.
        is_tail = jnp.logical_and(s == 1, j == nj - 1)
        # Odd tile count: the two splits overlap on exactly one tile (last tile
        # of split 0 == first tile of split 1).  Count it once for the sum;
        # max is idempotent so double-counting is harmless.
        is_dup = jnp.logical_and(s == 1, j == 0)
        special = jnp.zeros((), jnp.bool_)
        if has_tail:
            special = jnp.logical_or(special, is_tail)
        if has_dup:
            special = jnp.logical_or(special, is_dup)

        @pl.when(jnp.logical_not(special))
        def _bulk():
            _accumulate(x, x)

        if has_tail:
            @pl.when(is_tail)
            def _tail():
                lane = jax.lax.broadcasted_iota(jnp.int32, (1, hw_tile), 1)
                valid = lane < tail_len
                _accumulate(jnp.where(valid, x, -jnp.inf),
                            jnp.where(valid, x, 0.0))

        if has_dup:
            @pl.when(is_dup)
            def _dup():
                max_acc[...] = jnp.maximum(
                    max_acc[...], jnp.max(x, axis=-1, keepdims=True))

    @pl.when(j == nj - 1)
    def _finalize():
        max_ref[...] = max_acc[...][None].astype(max_ref.dtype)   # (1, C, 1)
        sum_ref[...] = sum_acc[...][None].astype(sum_ref.dtype)


def _pooled_scale_split_hw(x_chw, w1, b1, w2, b2, vmem_budget_bytes):
    """B == 1: parallel partial max/sum over two HW halves; combine + tiny MLP
    (on a single (1, C) vector) in the wrapper where XLA fuses it for free."""
    C, HW = x_chw.shape
    itemsize = jnp.dtype(x_chw.dtype).itemsize
    hw_padded = _round_up(HW, 128)

    budget_hw = max(128, (vmem_budget_bytes // (2 * C * itemsize) // 128) * 128)
    # Aim for ~8 tiles total -> a few pipeline steps per split.
    hw_tile = min(hw_padded, budget_hw, 2048,
                  max(128, _round_up(_cdiv(hw_padded, 8), 128)))
    n_tiles = _cdiv(HW, hw_tile)
    if n_tiles < 2:   # not enough work to split -> single-sweep main path
        return _pooled_scale(x_chw[None], w1, b1, w2, b2, vmem_budget_bytes)

    tiles_per_split = _cdiv(n_tiles, 2)
    offset = n_tiles - tiles_per_split       # first global tile of split 1
    has_dup = (n_tiles % 2 == 1)             # splits overlap on one tile
    tail_len = HW - (n_tiles - 1) * hw_tile

    kernel = functools.partial(_partial_pool_kernel, hw_tile=hw_tile,
                               tail_len=tail_len, has_dup=has_dup)
    footprint = 2 * C * hw_tile * itemsize + 2 * 2 * (2 * C * 4) + 2 * C * 4

    max_part, sum_part = pl.pallas_call(
        kernel,
        out_shape=(jax.ShapeDtypeStruct((2, C, 1), jnp.float32),
                   jax.ShapeDtypeStruct((2, C, 1), jnp.float32)),
        grid_spec=pltpu.PrefetchScalarGridSpec(
            num_scalar_prefetch=0,
            grid=(2, tiles_per_split),
            in_specs=[pl.BlockSpec((C, hw_tile),
                                   lambda s, j: (0, s * offset + j))],
            out_specs=[pl.BlockSpec((1, C, 1), lambda s, j: (s, 0, 0)),
                       pl.BlockSpec((1, C, 1), lambda s, j: (s, 0, 0))],
            scratch_shapes=[pltpu.VMEM((C, 1), jnp.float32),   # running max
                            pltpu.VMEM((C, 1), jnp.float32)],  # running sum
        ),
        compiler_params=pltpu.CompilerParams(
            dimension_semantics=("parallel", "arbitrary"),
            vmem_limit_bytes=_vmem_limit(footprint),
        ),
    )(x_chw)

    max_p = jnp.max(max_part, axis=0).reshape(1, C)
    avg_p = (jnp.sum(sum_part, axis=0) / HW).reshape(1, C)

    def mlp(v):
        return jnp.maximum(v @ w1.T + b1, 0.0) @ w2.T + b2

    return jax.nn.sigmoid(mlp(max_p) + mlp(avg_p)).astype(x_chw.dtype)


# ----------------------------------------------------------------------------
# Public wrapper
# ----------------------------------------------------------------------------
def channel_attention(x_nchw, w1, b1, w2, b2, *, vmem_budget_bytes=None):
    """x_nchw: (B, C, H, W) -> scale (B, C, H, W), matching the PyTorch module.

    w1: (hidden, C), b1: (hidden,), w2: (C, hidden), b2: (C,)  (PyTorch Linear).
    """
    B, C, H, W = x_nchw.shape
    HW = H * W
    x_flat = x_nchw.reshape(B, C, HW)
    if vmem_budget_bytes is None:
        vmem_budget_bytes = _default_vmem_budget()

    if B == 1 and _round_up(HW, 128) >= 256:
        scale = _pooled_scale_split_hw(x_flat[0], w1, b1, w2, b2,
                                       vmem_budget_bytes)
    else:
        scale = _pooled_scale(x_flat, w1, b1, w2, b2, vmem_budget_bytes)

    # expand_as(x) done wrapper-side: XLA fuses the broadcast into the consumer
    # (e.g. x * scale) so the full (B,C,H,W) scale is never a standalone
    # HBM write from the kernel.
    return jnp.broadcast_to(scale[:, :, None, None], (B, C, H, W))


# ----------------------------------------------------------------------------
# Reference + tests
# ----------------------------------------------------------------------------
def reference(x_nchw, w1, b1, w2, b2):
    """Pure-JAX reference mirroring the PyTorch module."""
    max_p = jnp.max(x_nchw, axis=(2, 3))     # (B, C)
    avg_p = jnp.mean(x_nchw, axis=(2, 3))    # (B, C)

    def mlp(v):
        h = jnp.maximum(v @ w1.T + b1, 0.0)
        return h @ w2.T + b2

    scale = jax.nn.sigmoid(mlp(max_p) + mlp(avg_p))          # (B, C)
    return jnp.broadcast_to(scale[:, :, None, None], x_nchw.shape)


def _make_params(key, C, hidden):
    k1, k2, k3, k4 = jax.random.split(key, 4)
    bound1 = 1.0 / jnp.sqrt(C)
    bound2 = 1.0 / jnp.sqrt(hidden)
    w1 = jax.random.uniform(k1, (hidden, C), jnp.float32, -bound1, bound1)
    b1 = jax.random.uniform(k2, (hidden,), jnp.float32, -bound1, bound1)
    w2 = jax.random.uniform(k3, (C, hidden), jnp.float32, -bound2, bound2)
    b2 = jax.random.uniform(k4, (C,), jnp.float32, -bound2, bound2)
    return w1, b1, w2, b2


if __name__ == "__main__":
    key = jax.random.PRNGKey(0)
    reduction = 16

    cases = [
        (2, 32, 16, 16),    # HW multiple of 128, 2 parallel B-tiles, no tail
        (3, 64, 14, 14),    # HW = 196 -> masked tail tile only on last HW step
        (1, 128, 18, 18),   # B == 1 -> HW-split path (odd tiles: dup + tail)
        (1, 64, 32, 32),    # B == 1 -> HW-split path (even tiles, no masking)
    ]
    for (B, C, H, W) in cases:
        hidden = max(1, C // reduction)
        key, kx, kp = jax.random.split(key, 3)
        x = jax.random.normal(kx, (B, C, H, W), dtype=jnp.float32)
        w1, b1, w2, b2 = _make_params(kp, C, hidden)

        out = channel_attention(x, w1, b1, w2, b2)
        jax.block_until_ready(out)
        ref = reference(x, w1, b1, w2, b2)
        assert out.shape == (B, C, H, W)
        assert jnp.allclose(out, ref, atol=1e-5, rtol=1e-5), \
            f"mismatch for shape {(B, C, H, W)}"

    print("KERNEL_OK")
</pallas_src>

<mosaic_0001>
module attributes {stable_mosaic.version = 11 : i64} {
  func.func @_channel_attention_kernel(%arg0: i32, %arg1: i32, %arg2: memref<1x32x256xf32, #tpu.memory_space<vmem>>, %arg3: memref<32x2xf32, #tpu.memory_space<vmem>>, %arg4: memref<1x2xf32, #tpu.memory_space<vmem>>, %arg5: memref<2x32xf32, #tpu.memory_space<vmem>>, %arg6: memref<1x32xf32, #tpu.memory_space<vmem>>, %arg7: memref<1x1x32xf32, #tpu.memory_space<vmem>>, %arg8: memref<1x32xf32, #tpu.memory_space<vmem>>, %arg9: memref<1x32xf32, #tpu.memory_space<vmem>>) attributes {dimension_semantics = [#tpu.dimension_semantics<parallel>, #tpu.dimension_semantics<arbitrary>], iteration_bounds = array<i64: 2, 1>, scalar_prefetch = 0 : i64, scratch_operands = 2 : i64, tpu.core_type = #tpu.core_type<tc>, window_params = [{transform_indices = @transform_0, window_bounds = array<i64: 1, 32, 256>}, {pipeline_mode = #tpu.pipeline_mode<synchronous>, transform_indices = @transform_1, window_bounds = array<i64: 32, 2>}, {pipeline_mode = #tpu.pipeline_mode<synchronous>, transform_indices = @transform_2, window_bounds = array<i64: 1, 2>}, {pipeline_mode = #tpu.pipeline_mode<synchronous>, transform_indices = @transform_3, window_bounds = array<i64: 2, 32>}, {pipeline_mode = #tpu.pipeline_mode<synchronous>, transform_indices = @transform_4, window_bounds = array<i64: 1, 32>}, {transform_indices = @transform_5, window_bounds = array<i64: 1, 1, 32>}]} {
    %c0_i32 = arith.constant 0 : i32
    %0 = arith.cmpi eq, %arg1, %c0_i32 : i32
    %1 = arith.extui %0 : i1 to i32
    %c0_i32_0 = arith.constant 0 : i32
    %2 = arith.cmpi ne, %1, %c0_i32_0 : i32
    scf.if %2 {
      %cst_14 = arith.constant 0xFF800000 : f32
      %15 = vector.broadcast %cst_14 : f32 to vector<1x32xf32>
      %c0_15 = arith.constant 0 : index
      %c0_16 = arith.constant 0 : index
      %16 = vector.load %arg8[%c0_15, %c0_16] : memref<1x32xf32, #tpu.memory_space<vmem>>, vector<1x32xf32>
      tpu.vector_store %arg8[%c0_15, %c0_16], %15 {strides = array<i32>} : memref<1x32xf32, #tpu.memory_space<vmem>>, vector<1x32xf32>,
      %cst_17 = arith.constant 0.000000e+00 : f32
      %17 = vector.broadcast %cst_17 : f32 to vector<1x32xf32>
      %c0_18 = arith.constant 0 : index
      %c0_19 = arith.constant 0 : index
      %18 = vector.load %arg9[%c0_18, %c0_19] : memref<1x32xf32, #tpu.memory_space<vmem>>, vector<1x32xf32>
      tpu.vector_store %arg9[%c0_18, %c0_19], %17 {strides = array<i32>} : memref<1x32xf32, #tpu.memory_space<vmem>>, vector<1x32xf32>,
    } else {
    }
    %c0 = arith.constant 0 : index
    %c0_1 = arith.constant 0 : index
    %c0_2 = arith.constant 0 : index
    %3 = vector.load %arg2[%c0, %c0_1, %c0_2] : memref<1x32x256xf32, #tpu.memory_space<vmem>>, vector<1x32x256xf32>
    %c0_3 = arith.constant 0 : index
    %c0_4 = arith.constant 0 : index
    %4 = vector.load %arg8[%c0_3, %c0_4] : memref<1x32xf32, #tpu.memory_space<vmem>>, vector<1x32xf32>
    %cst = arith.constant dense<0xFF800000> : vector<1x32xf32>
    %5 = vector.multi_reduction <maximumf>, %3, %cst [2] : vector<1x32x256xf32> to vector<1x32xf32>
    %6 = arith.maximumf %4, %5 : vector<1x32xf32>
    %c0_5 = arith.constant 0 : index
    %c0_6 = arith.constant 0 : index
    %7 = vector.load %arg8[%c0_5, %c0_6] : memref<1x32xf32, #tpu.memory_space<vmem>>, vector<1x32xf32>
    tpu.vector_store %arg8[%c0_5, %c0_6], %6 {strides = array<i32>} : memref<1x32xf32, #tpu.memory_space<vmem>>, vector<1x32xf32>,
    %c0_7 = arith.constant 0 : index
    %c0_8 = arith.constant 0 : index
    %8 = vector.load %arg9[%c0_7, %c0_8] : memref<1x32xf32, #tpu.memory_space<vmem>>, vector<1x32xf32>
    %cst_9 = arith.constant dense<0.000000e+00> : vector<1x32xf32>
    %9 = vector.multi_reduction <add>, %3, %cst_9 [2] : vector<1x32x256xf32> to vector<1x32xf32>
    %10 = arith.addf %8, %9 : vector<1x32xf32>
    %c0_10 = arith.constant 0 : index
    %c0_11 = arith.constant 0 : index
    %11 = vector.load %arg9[%c0_10, %c0_11] : memref<1x32xf32, #tpu.memory_space<vmem>>, vector<1x32xf32>
    tpu.vector_store %arg9[%c0_10, %c0_11], %10 {strides = array<i32>} : memref<1x32xf32, #tpu.memory_space<vmem>>, vector<1x32xf32>,
    %c0_i32_12 = arith.constant 0 : i32
    %12 = arith.cmpi eq, %arg1, %c0_i32_12 : i32
    %13 = arith.extui %12 : i1 to i32
    %c0_i32_13 = arith.constant 0 : i32
    %14 = arith.cmpi ne, %13, %c0_i32_13 : i32
    scf.if %14 {
      %c0_14 = arith.constant 0 : index
      %c0_15 = arith.constant 0 : index
      %15 = vector.load %arg8[%c0_14, %c0_15] : memref<1x32xf32, #tpu.memory_space<vmem>>, vector<1x32xf32>
      %c0_16 = arith.constant 0 : index
      %c0_17 = arith.constant 0 : index
      %16 = vector.load %arg9[%c0_16, %c0_17] : memref<1x32xf32, #tpu.memory_space<vmem>>, vector<1x32xf32>
      %cst_18 = arith.constant 3.906250e-03 : f32
      %17 = vector.broadcast %cst_18 : f32 to vector<1x32xf32>
      %18 = arith.mulf %16, %17 : vector<1x32xf32>
      %19 = tpu.concatenate %15, %18 in 0 : vector<1x32xf32>, vector<1x32xf32> -> vector<2x32xf32>
      %c0_19 = arith.constant 0 : index
      %c0_20 = arith.constant 0 : index
      %20 = vector.load %arg3[%c0_19, %c0_20] : memref<32x2xf32, #tpu.memory_space<vmem>>, vector<32x2xf32>
      %cst_21 = arith.constant dense<0.000000e+00> : vector<2x2xf32>
      %21 = tpu.matmul %19, %20, %cst_21 {dimension_numbers = #tpu.dot_dimension_numbers<[1], [0], [0], [1], [0, 0, 1, 1], [], []>} : vector<2x32xf32>, vector<32x2xf32>, vector<2x2xf32> -> vector<2x2xf32>
      %c0_22 = arith.constant 0 : index
      %c0_23 = arith.constant 0 : index
      %22 = vector.load %arg4[%c0_22, %c0_23] : memref<1x2xf32, #tpu.memory_space<vmem>>, vector<1x2xf32>
      %23 = vector.broadcast %22 : vector<1x2xf32> to vector<2x2xf32>
      %24 = arith.addf %21, %23 : vector<2x2xf32>
      %cst_24 = arith.constant 0.000000e+00 : f32
      %25 = vector.broadcast %cst_24 : f32 to vector<2x2xf32>
      %26 = arith.maximumf %24, %25 : vector<2x2xf32>
      %c0_25 = arith.constant 0 : index
      %c0_26 = arith.constant 0 : index
      %27 = vector.load %arg5[%c0_25, %c0_26] : memref<2x32xf32, #tpu.memory_space<vmem>>, vector<2x32xf32>
      %cst_27 = arith.constant dense<0.000000e+00> : vector<2x32xf32>
      %28 = tpu.matmul %26, %27, %cst_27 {dimension_numbers = #tpu.dot_dimension_numbers<[1], [0], [0], [1], [0, 0, 1, 1], [], []>} : vector<2x2xf32>, vector<2x32xf32>, vector<2x32xf32> -> vector<2x32xf32>
      %c0_28 = arith.constant 0 : index
      %c0_29 = arith.constant 0 : index
      %29 = vector.load %arg6[%c0_28, %c0_29] : memref<1x32xf32, #tpu.memory_space<vmem>>, vector<1x32xf32>
      %30 = vector.broadcast %29 : vector<1x32xf32> to vector<2x32xf32>
      %31 = arith.addf %28, %30 : vector<2x32xf32>
      %32 = vector.extract_strided_slice %31 {offsets = [0, 0], sizes = [1, 32], strides = [1, 1]} : vector<2x32xf32> to vector<1x32xf32>
      %33 = vector.extract_strided_slice %31 {offsets = [1, 0], sizes = [1, 32], strides = [1, 1]} : vector<2x32xf32> to vector<1x32xf32>
      %34 = arith.addf %32, %33 : vector<1x32xf32>
      %35 = arith.negf %34 : vector<1x32xf32>
      %36 = math.exp %35 : vector<1x32xf32>
      %cst_30 = arith.constant 1.000000e+00 : f32
      %37 = vector.broadcast %cst_30 : f32 to vector<1x32xf32>
      %38 = arith.addf %37, %36 : vector<1x32xf32>
      %39 = arith.divf %37, %38 : vector<1x32xf32>
      %40 = vector.shape_cast %39 : vector<1x32xf32> to vector<1x1x32xf32>
      %c0_31 = arith.constant 0 : index
      %c0_32 = arith.constant 0 : index
      %c0_33 = arith.constant 0 : index
      %41 = vector.load %arg7[%c0_31, %c0_32, %c0_33] : memref<1x1x32xf32, #tpu.memory_space<vmem>>, vector<1x1x32xf32>
      tpu.vector_store %arg7[%c0_31, %c0_32, %c0_33], %40 {strides = array<i32>} : memref<1x1x32xf32, #tpu.memory_space<vmem>>, vector<1x1x32xf32>,
    } else {
    }
    return
  }
  func.func @transform_0(%arg0: i32, %arg1: i32) -> (i32, i32, i32) {
    %c0_i32 = arith.constant 0 : i32
    %c0_i32_0 = arith.constant 0 : i32
    return %arg0, %c0_i32, %arg1 : i32, i32, i32
  }
  func.func @transform_1(%arg0: i32, %arg1: i32) -> (i32, i32) {
    %c0_i32 = arith.constant 0 : i32
    %c0_i32_0 = arith.constant 0 : i32
    %c0_i32_1 = arith.constant 0 : i32
    return %c0_i32, %c0_i32_0 : i32, i32
  }
  func.func @transform_2(%arg0: i32, %arg1: i32) -> (i32, i32) {
    %c0_i32 = arith.constant 0 : i32
    %c0_i32_0 = arith.constant 0 : i32
    %c0_i32_1 = arith.constant 0 : i32
    return %c0_i32, %c0_i32_0 : i32, i32
  }
  func.func @transform_3(%arg0: i32, %arg1: i32) -> (i32, i32) {
    %c0_i32 = arith.constant 0 : i32
    %c0_i32_0 = arith.constant 0 : i32
    %c0_i32_1 = arith.constant 0 : i32
    return %c0_i32, %c0_i32_0 : i32, i32
  }
  func.func @transform_4(%arg0: i32, %arg1: i32) -> (i32, i32) {
    %c0_i32 = arith.constant 0 : i32
    %c0_i32_0 = arith.constant 0 : i32
    %c0_i32_1 = arith.constant 0 : i32
    return %c0_i32, %c0_i32_0 : i32, i32
  }
  func.func @transform_5(%arg0: i32, %arg1: i32) -> (i32, i32, i32) {
    %c0_i32 = arith.constant 0 : i32
    %c0_i32_0 = arith.constant 0 : i32
    %c0_i32_1 = arith.constant 0 : i32
    return %arg0, %c0_i32, %c0_i32_0 : i32, i32, i32
  }
}

</mosaic_0001>

<bundles_post_ra>
// kernel: tpu_custom_call.1
= control target key start
LH: loop header
LB: loop body
LE: loop exit
PB: predicated region body
PF: predicated region fallthrough
CT: control target
= control target key end

     0   :  { %10 = vsyncpa [#allocation5], 0  ;;  %s1105_s0 = inlined_call_operand.hbm [shape: f32[2,32,256], index: 0, kind: input, shape index: {}]   ;;  %s1106_s1 = inlined_call_operand.vmem [shape: f32[32,2], index: 1, kind: input, shape index: {}]   ;;  %s1107_s2 = inlined_call_operand.vmem [shape: f32[1,2], index: 2, kind: input, shape index: {}]   ;;  %s1108_s3 = inlined_call_operand.vmem [shape: f32[2,32], index: 3, kind: input, shape index: {}]   ;;  %s1109_s4 = inlined_call_operand.vmem [shape: f32[1,32], index: 4, kind: input, shape index: {}]   ;;  %s1110_s5 = inlined_call_operand.hbm [shape: f32[2,1,32], index: 5, kind: output, shape index: {}]  }
   0x1   :  { %12 = vsyncpa [#allocation5 + $0x1], 0 }
   0x2   :  { %13 = vsyncpa [#allocation6], 0 }
   0x3   :  { %15 = vsyncpa [#allocation6 + $0x1], 0  ;;  %s945_s18 = smov 0   ;;  %s947_s19 = smov 0  }
   0x4   :  { %s949_s20 = smov 0   ;;  %s951_s21 = smov 0  }
   0x5   :  { %s953_s22 = smov 0   ;;  %s955_s23 = smov 0  }
   0x6 LB: > { %s704_s24 = sadd.s32 4294967295, %s908_s23   ;;  %s705_s25 = sadd.s32 4294967294, %s908_s23   ;;  %s908_s23 = sphi %s955_s23, %s21_s23   ;;  %s904_s22 = sphi %s953_s22, %s1119_s22   ;;  %s900_s21 = sphi %s951_s21, %s1118_s21   ;;  %s896_s20 = sphi %s949_s20, %s1117_s20   ;;  %s892_s19 = sphi %s947_s19, %s1116_s19   ;;  %s888_s18 = sphi %s945_s18, %s1115_s18  }
   0x7   : > { %s33_s26 = sadd.s32 1, %s904_s22  ;;  %s42_s27 = sadd.s32 1, %s896_s20 }
   0x8   : > { %p35_p0 = scmp.ge.s32.totalorder %s33_s26, 2  ;;  %p49_p1 = scmp.ne.s32.totalorder %s896_s20, %s892_s19 }
   0x9   : > { %p50_p2 = scmp.eq.s32.totalorder %s908_s23, 0  ;;  %p55_p3 = scmp.ne.s32.totalorder %s892_s19, %s888_s18 }
   0xa   : > { %s1121_s26 = smov (%p35_p0, %s33_s26), 0  ;;  %p56_p5 = scmp.eq.s32.totalorder %s704_s24, 0 }
   0xb   : > { %p986_p4 = por %p50_p2, %p49_p1  ;;  %s37_s29 = ssub.s32 %s904_s22, %s1121_s26 }
   0xc   : > { %p163_p6 = scmp.eq.s32.totalorder %s704_s24, 1  ;;  %p40_p7 = scmp.eq.s32.totalorder %s37_s29, 0 }
   0xd   : > { %p992_p8 = por %p56_p5, %p55_p3  ;;  %p169_p10 = scmp.eq.s32.totalorder %s705_s25, 1 }
   0xe   : > { %p996_p9 = por %p163_p6, %p49_p1  ;;  %p707_p12 = scmp.ge.s32.totalorder %s908_s23, 2 }
   0xf   : > { %s1001_s7 = scalar_select %p40_p7, %s896_s20, %s42_s27  }
  0x10   : > { %p1003_p11 = por %p169_p10, %p55_p3  ;;  %p732_p13 = scmp.lt.s32.totalorder %s908_s23, 2 }
  0x11   : > { %s201_s9 = sand.u32 1, %s896_s20   ;;  %s719_s11 = sshll.u32 %s904_s22, 6 }
  0x12   : > { %s708_s10 = sshll.u32 %s201_s9, 6  ;;  %s212_s14 = scalar_lea.hbm %s1105_s0, %s719_s11 }
  0x13   : > { %s205_s15 = scalar_lea.vmem [#allocation4], %s708_s10  ;;  %s213_s17 = sshll.u32 %s212_s14, 4  ;;  %s214_s17 = int_to_ptr.hbm [resolvable:$true] %s213_s17 }
  0x14   : > { %s215_s16 = sshll.u32 %s205_s15, 4  ;;  %p725_p0 = pnand %p732_p13, %p986_p4  ;;  %s216_s16 = int_to_ptr.vmem [resolvable:$true] %s215_s16 }
  0x15   : > { %p711_p1 = scmp.ge.s32.totalorder %s908_s23, 1  ;;  %s202_s24 = scalar_lea.sflag [#allocation5], %s201_s9 }
  0x16   : > { %s910_s25 = smov 256   ;;  %s911_s27 = smov 16  }
  0x17   : > { %727 = dma.hbm_to_vmem [thread:$0]  (!%p725_p0), %s214_s17, 1024, %s216_s16, %s202_s24, %s910_s25, %s910_s25, %s911_s27  }
  0x18   : > { %p223_p2 = scmp.lt.s32.totalorder %s908_s23, 3 }
  0x1a   : > { %p224_p3 = pnand %p711_p1, %p223_p2 }
  0x1b   : > { %s1019_s29 = sand.u32 (!%p224_p3), 1, %s892_s19  }
  0x1c   : > { %227 = sbr.rel (%p224_p3) target bundleno = 690 (0x2b2), region = 40  ;;  %s712_s10 = sshll.u32 (!%p224_p3), %s1019_s29, 6 }
  0x1d   : > { %s230_s11 = scalar_lea.sflag (!%p224_p3), [#allocation5], %s1019_s29  ;;  %s233_s12 = scalar_lea.vmem (!%p224_p3), [#allocation4], %s712_s10 }
  0x21   : > { %879 = dma.done.wait (%p992_p8), %s230_s11, 1024  }
  0x22   : > { %881 = vsyncadd (%p992_p8), %s230_s11, 4294966272  ;;  %v268_v0 = vld [vmem:[%s233_s12] sm:$0xff]  ;;  %v269_v1 = vld [vmem:[%s233_s12 + $0x8] sm:$0xff]  ;;  %v912_v25 = vmov 0   ;;  %vm265_vm0 = vcmask 253952   ;;  %vm385_vm1 = vcmask 130112   ;;  %s623_s9 = scalar_lea.hbm %s1110_s5, %s900_s21 }
  0x23   : > { %v277_v2 = vmax.f32 %v268_v0, %v269_v1  ;;  %v272_v3 = vld [vmem:[%s233_s12 + $0x20] sm:$0xff]  ;;  %v273_v4 = vld [vmem:[%s233_s12 + $0x28] sm:$0xff]  ;;  %v400_v5 = vadd.f32 %v269_v1, %v268_v0  ;;  %v270_v7 = vld [vmem:[%s233_s12 + $0x10] sm:$0xff]  ;;  %789 = vset.pattern.permute.xlu1 %v912_v25  ;;  %787 = vset.pattern.permute.xlu2 %v912_v25  ;;  %vm393_vm2 = vcmask 261312   ;;  %vm389_vm3 = vcmask 195712   ;;  %s259_s13 = scalar_lea.vmem [#allocation7], %s1019_s29 }
  0x24   : > { %v283_v6 = vmax.f32 %v272_v3, %v273_v4  ;;  %v271_v8 = vld [vmem:[%s233_s12 + $0x18] sm:$0xff]  ;;  %v274_v9 = vld [vmem:[%s233_s12 + $0x30] sm:$0xff]  ;;  %v406_v14 = vadd.f32 %v273_v4, %v272_v3  ;;  %788 = vset.pattern.permute.xlu0 %v912_v25  ;;  %vm522_vm4 = vcmask 1040384   ;;  %vm532_vm5 = vcmask 261120   ;;  %s625_s14 = sshll.u32 %s259_s13, 4  ;;  %s627_s15 = sshll.u32 %s623_s9, 4  ;;  %s626_s14 = int_to_ptr.vmem [resolvable:$true] %s625_s14  ;;  %s628_s15 = int_to_ptr.hbm [resolvable:$true] %s627_s15 }
  0x25   : > { %278 = vmax.xlane.f32.xlu0 %v277_v2  ;;  %401 = vadd.xlane.f32.xlu2 %v400_v5  ;;  %v275_v10 = vld [vmem:[%s233_s12 + $0x38] sm:$0xff]  ;;  %v280_v11 = vmax.f32 %v270_v7, %v271_v8  ;;  %v403_v12 = vadd.f32 %v271_v8, %v270_v7  ;;  %vm566_vm6 = vcmask 1041408   ;;  %vm562_vm7 = vcmask 15360   ;;  %s615_s21 = scalar_lea.sflag [#allocation6], %s1019_s29  ;;  %s840_s16 = sshra.s32 %s628_s15, 4  ;;  %s841_s16 = int_to_ptr.hbm [resolvable:$true] %s840_s16 }
  0x26   : > { %284 = vmax.xlane.f32.xlu1 %v283_v6  ;;  %v286_v13 = vmax.f32 %v274_v9, %v275_v10  ;;  %v409_v15 = vadd.f32 %v275_v10, %v274_v9  ;;  %s842_s17 = scalar_lea.hbm %s841_s16, 1  ;;  %s846_s27 = scalar_lea.hbm %s1110_s5, 2 }
  0x27   : > { %p843_p4 = scmp.ne.s32.totalorder %s841_s16, %s842_s17  ;;  %p847_p7 = scmp.lt.s32.totalorder %s841_s16, %s1110_s5 }
  0x28   : > { %p848_p8 = scmp.lt.s32.totalorder %s846_s27, %s842_s17 }
  0x29   : > { %p844_p5 = pnand %p843_p4, %p996_p9 }
  0x2a   : > { %p849_p10 = por %p848_p8, %p847_p7 }
  0x2b   : > { %p845_p6 = pneg %p844_p5 }
  0x2d   : > { %281 = vmax.xlane.f32.xlu0 %v280_v11  ;;  %404 = vadd.xlane.f32.xlu2 %v403_v12  ;;  %p850_p13 = pnand %p849_p10, %p845_p6 }
  0x2e   : > { %287 = vmax.xlane.f32.xlu1 %v286_v13 }
  0x35   : > { %407 = vadd.xlane.f32.xlu0 %v406_v14 }
  0x36   : > { %410 = vadd.xlane.f32.xlu1 %v409_v15 }
  0x98   : > { %v279_v16 = vpop.xlane.xlu0 %278  ;;  %v402_v56 = vpop.xlane.xlu2 %401 }
  0x99   : > { %v293_v17 = vperm.slane %v279_v16, 0  ;;  %v294_v18 = vperm.slane %v279_v16, 1  ;;  %v295_v19 = vperm.slane %v279_v16, 2  ;;  %v296_v20 = vperm.slane %v279_v16, 3  ;;  %v285_v36 = vpop.xlane.xlu1 %284 }
  0x9a   : > { %v297_v21 = vperm.slane %v279_v16, 4  ;;  %v298_v22 = vperm.slane %v279_v16, 5  ;;  %v299_v23 = vperm.slane %v279_v16, 6  ;;  %v300_v24 = vperm.slane %v279_v16, 7 }
  0x9b   : > { %325 = vst [vmem:[#allocation1] ss:$9 sm:$0xff] %v293_v17  ;;  %v309_v37 = vperm.slane %v285_v36, 0  ;;  %v310_v38 = vperm.slane %v285_v36, 1  ;;  %v311_v39 = vperm.slane %v285_v36, 2  ;;  %v312_v41 = vperm.slane %v285_v36, 3 }
  0x9c   : > { %327 = vst [vmem:[#allocation1 + $0x1] ss:$9 sm:$0xff] %v294_v18  ;;  %v313_v42 = vperm.slane %v285_v36, 4  ;;  %v314_v43 = vperm.slane %v285_v36, 5  ;;  %v315_v44 = vperm.slane %v285_v36, 6  ;;  %v316_v45 = vperm.slane %v285_v36, 7 }
  0x9d   : > { %329 = vst [vmem:[#allocation1 + $0x2] ss:$9 sm:$0xff] %v295_v19  ;;  %v416_v57 = vperm.slane %v402_v56, 0  ;;  %v417_v58 = vperm.slane %v402_v56, 1  ;;  %v418_v59 = vperm.slane %v402_v56, 2  ;;  %v419_v61 = vperm.slane %v402_v56, 3 }
  0x9e   : > { %331 = vst [vmem:[#allocation1 + $0x3] ss:$9 sm:$0xff] %v296_v20  ;;  %v420_v62 = vperm.slane %v402_v56, 4  ;;  %v421_v63 = vperm.slane %v402_v56, 5  ;;  %v422_v0 = vperm.slane %v402_v56, 6  ;;  %v423_v1 = vperm.slane %v402_v56, 7 }
  0x9f   : > { %333 = vst [vmem:[#allocation1 + $0x4] ss:$9 sm:$0xff] %v297_v21  ;;  %v527_v36 = vld [vmem:[%s1106_s1 + $0x18] sm:$0xff] }
  0xa0   : > { %335 = vst [vmem:[#allocation1 + $0x5] ss:$9 sm:$0xff] %v298_v22  ;;  %v282_v26 = vpop.xlane.xlu0 %281  ;;  %v405_v2 = vpop.xlane.xlu2 %404  ;;  %548 = vmatpush.msra.mxu0 %v527_v36 }
  0xa1   : > { %337 = vst [vmem:[#allocation1 + $0x6] ss:$9 sm:$0xff] %v299_v23  ;;  %v301_v27 = vperm.slane %v282_v26, 0  ;;  %v302_v28 = vperm.slane %v282_v26, 1  ;;  %v303_v29 = vperm.slane %v282_v26, 2  ;;  %v304_v31 = vperm.slane %v282_v26, 3  ;;  %v288_v46 = vpop.xlane.xlu1 %287 }
  0xa2   : > { %339 = vst [vmem:[#allocation1 + $0x7] ss:$9 sm:$0xff] %v300_v24  ;;  %v305_v32 = vperm.slane %v282_v26, 4  ;;  %v306_v33 = vperm.slane %v282_v26, 5  ;;  %v307_v34 = vperm.slane %v282_v26, 6  ;;  %v308_v35 = vperm.slane %v282_v26, 7 }
  0xa3   : > { %v317_v47 = vperm.slane %v288_v46, 0  ;;  %v318_v48 = vperm.slane %v288_v46, 1  ;;  %v319_v49 = vperm.slane %v288_v46, 2  ;;  %v320_v51 = vperm.slane %v288_v46, 3 }
  0xa4   : > { %v321_v52 = vperm.slane %v288_v46, 4  ;;  %v322_v53 = vperm.slane %v288_v46, 5  ;;  %v323_v54 = vperm.slane %v288_v46, 6  ;;  %v324_v55 = vperm.slane %v288_v46, 7 }
  0xa5   : > { %v424_v3 = vperm.slane %v405_v2, 0  ;;  %v425_v4 = vperm.slane %v405_v2, 1  ;;  %v426_v5 = vperm.slane %v405_v2, 2  ;;  %v427_v7 = vperm.slane %v405_v2, 3 }
  0xa6   : > { %v428_v8 = vperm.slane %v405_v2, 4  ;;  %v429_v9 = vperm.slane %v405_v2, 5  ;;  %v430_v10 = vperm.slane %v405_v2, 6  ;;  %v431_v11 = vperm.slane %v405_v2, 7 }
  0xa8   : > { %v408_v12 = vpop.xlane.xlu0 %407 }
  0xa9   : > { %v1027_v30 = vld [vmem:[#allocation1] sm:$0xff]  ;;  %v432_v13 = vperm.slane %v408_v12, 0  ;;  %v433_v14 = vperm.slane %v408_v12, 1  ;;  %v434_v15 = vperm.slane %v408_v12, 2  ;;  %v435_v16 = vperm.slane %v408_v12, 3  ;;  %v411_v22 = vpop.xlane.xlu1 %410 }
  0xaa   : > { %341 = vst [vmem:[#allocation1] ss:$9 sm:$0xff] %v301_v27  ;;  %v436_v18 = vperm.slane %v408_v12, 4  ;;  %v437_v19 = vperm.slane %v408_v12, 5  ;;  %v438_v20 = vperm.slane %v408_v12, 6  ;;  %v439_v21 = vperm.slane %v408_v12, 7 }
  0xab   : > { %342 = vst [vmem:[#allocation1 + $0x1] ss:$9 sm:$0xff] %v302_v28  ;;  %v440_v23 = vperm.slane %v411_v22, 0  ;;  %v441_v24 = vperm.slane %v411_v22, 1  ;;  %v442_v25 = vperm.slane %v411_v22, 2  ;;  %v443_v26 = vperm.slane %v411_v22, 3 }
  0xac   : > { %343 = vst [vmem:[#allocation1 + $0x2] ss:$9 sm:$0xff] %v303_v29  ;;  %v444_v28 = vperm.slane %v411_v22, 4  ;;  %v445_v29 = vperm.slane %v411_v22, 5  ;;  %v790_v12 = vld [vmem:[%s1107_s2] ss:$0 sm:$0xff] }
  0xad   : > { %344 = vst [vmem:[#allocation1 + $0x3] ss:$9 sm:$0xff] %v304_v31  ;;  %v447_v31 = vperm.slane %v411_v22, 7 }
  0xae   : > { %345 = vst [vmem:[#allocation1 + $0x4] ss:$9 sm:$0xff] %v305_v32 }
  0xaf   : > { %346 = vst [vmem:[#allocation1 + $0x5] ss:$9 sm:$0xff] %v306_v33  ;;  %v913_v33 = vmov 0.0  }
  0xb0   : > { %347 = vst [vmem:[#allocation1 + $0x6] ss:$9 sm:$0xff] %v307_v34 }
  0xb1   : > { %348 = vst [vmem:[#allocation1 + $0x7] ss:$9 sm:$0xff] %v308_v35  ;;  %v914_v35 = vmov -inf  }
  0xb2   : > { %267 = vst.msk [vmem:[#allocation3] sm:$0x1] %vm265_vm0, %v913_v33 }
  0xb3   : > { %266 = vst.msk [vmem:[#allocation2] sm:$0x1] %vm265_vm0, %v914_v35 }
  0xb8   : > { %v349_v40 = vld [vmem:[#allocation1] sm:$0xff] }
  0xb9   : > { %350 = vst [vmem:[#allocation1] ss:$9 sm:$0xff] %v309_v37  ;;  %372 = vperm.xlu1 %789, %v349_v40   ;;  %v526_v37 = vld [vmem:[%s1106_s1 + $0x10] sm:$0xff]  ;;  %v524_v40 = vld [vmem:[%s1106_s1] sm:$0xff] }
  0xba   : > { %351 = vst [vmem:[#allocation1 + $0x1] ss:$9 sm:$0xff] %v310_v38  ;;  %v525_v38 = vld [vmem:[%s1106_s1 + $0x8] sm:$0xff]  ;;  %549 = vmatpush.msra.mxu0 %v526_v37 }
  0xbb   : > { %352 = vst [vmem:[#allocation1 + $0x2] ss:$9 sm:$0xff] %v311_v39 }
  0xbc   : > { %353 = vst [vmem:[#allocation1 + $0x3] ss:$9 sm:$0xff] %v312_v41  ;;  %550 = vmatpush.msra.mxu0 %v525_v38  ;;  %v380_v41 = vlaneseq }
  0xbd   : > { %354 = vst [vmem:[#allocation1 + $0x4] ss:$9 sm:$0xff] %v313_v42 }
  0xbe   : > { %355 = vst [vmem:[#allocation1 + $0x5] ss:$9 sm:$0xff] %v314_v43  ;;  %551 = vmatpush.msra.mxu0 %v524_v40  ;;  %v381_v42 = vand.u32 127, %v380_v41 }
  0xbf   : > { %356 = vst [vmem:[#allocation1 + $0x6] ss:$9 sm:$0xff] %v315_v44 }
  0xc0   : > { %357 = vst [vmem:[#allocation1 + $0x7] ss:$9 sm:$0xff] %v316_v45  ;;  %v383_v46 = vadd.s32 4294967288, %v381_v42 }
  0xc7   : > { %v1029_v50 = vld [vmem:[#allocation1] sm:$0xff] }
  0xc8   : > { %359 = vst [vmem:[#allocation1] ss:$9 sm:$0xff] %v317_v47  ;;  %v391_v47 = vadd.s32 4294967272, %v381_v42 }
  0xc9   : > { %360 = vst [vmem:[#allocation1 + $0x1] ss:$9 sm:$0xff] %v318_v48 }
  0xca   : > { %361 = vst [vmem:[#allocation1 + $0x2] ss:$9 sm:$0xff] %v319_v49  ;;  %v387_v49 = vadd.s32 4294967280, %v381_v42 }
  0xcb   : > { %362 = vst [vmem:[#allocation1 + $0x3] ss:$9 sm:$0xff] %v320_v51 }
  0xcc   : > { %363 = vst [vmem:[#allocation1 + $0x4] ss:$9 sm:$0xff] %v321_v52 }
  0xcd   : > { %364 = vst [vmem:[#allocation1 + $0x5] ss:$9 sm:$0xff] %v322_v53 }
  0xce   : > { %365 = vst [vmem:[#allocation1 + $0x6] ss:$9 sm:$0xff] %v323_v54 }
  0xcf   : > { %366 = vst [vmem:[#allocation1 + $0x7] ss:$9 sm:$0xff] %v324_v55  ;;  %v399_v55 = vld [vmem:[#allocation3] sm:$0x1] }
  0xd6   : > { %v1031_v60 = vld [vmem:[#allocation1] sm:$0xff] }
  0xd7   : > { %448 = vst [vmem:[#allocation1] ss:$9 sm:$0xff] %v416_v57 }
  0xd8   : > { %450 = vst [vmem:[#allocation1 + $0x1] ss:$9 sm:$0xff] %v417_v58 }
  0xd9   : > { %452 = vst [vmem:[#allocation1 + $0x2] ss:$9 sm:$0xff] %v418_v59 }
  0xda   : > { %454 = vst [vmem:[#allocation1 + $0x3] ss:$9 sm:$0xff] %v419_v61 }
  0xdb   : > { %456 = vst [vmem:[#allocation1 + $0x4] ss:$9 sm:$0xff] %v420_v62 }
  0xdc   : > { %458 = vst [vmem:[#allocation1 + $0x5] ss:$9 sm:$0xff] %v421_v63 }
  0xdd   : > { %460 = vst [vmem:[#allocation1 + $0x6] ss:$9 sm:$0xff] %v422_v0 }
  0xde   : > { %462 = vst [vmem:[#allocation1 + $0x7] ss:$9 sm:$0xff] %v423_v1  ;;  %v276_v1 = vld [vmem:[#allocation2] sm:$0x1] }
  0xe5   : > { %v463_v6 = vld [vmem:[#allocation1] sm:$0xff] }
  0xe6   : > { %464 = vst [vmem:[#allocation1] ss:$9 sm:$0xff] %v424_v3  ;;  %492 = vperm.xlu2 %787, %v463_v6  }
  0xe7   : > { %465 = vst [vmem:[#allocation1 + $0x1] ss:$9 sm:$0xff] %v425_v4 }
  0xe8   : > { %466 = vst [vmem:[#allocation1 + $0x2] ss:$9 sm:$0xff] %v426_v5 }
  0xe9   : > { %467 = vst [vmem:[#allocation1 + $0x3] ss:$9 sm:$0xff] %v427_v7 }
  0xea   : > { %468 = vst [vmem:[#allocation1 + $0x4] ss:$9 sm:$0xff] %v428_v8 }
  0xeb   : > { %469 = vst [vmem:[#allocation1 + $0x5] ss:$9 sm:$0xff] %v429_v9 }
  0xec   : > { %470 = vst [vmem:[#allocation1 + $0x6] ss:$9 sm:$0xff] %v430_v10 }
  0xed   : > { %471 = vst [vmem:[#allocation1 + $0x7] ss:$9 sm:$0xff] %v431_v11  ;;  %v557_v11 = vld [vmem:[%s1108_s3] sm:$0x3] }
  0xee   : > { %369 = vperm.xlu2 %787, %v1027_v30   ;;  %v446_v30 = vperm.slane %v411_v22, 6  ;;  %714 = vmatpush.msk.msra.mxu1 %vm566_vm6, %v557_v11 }
  0xf4   : > { %v472_v17 = vld [vmem:[#allocation1] sm:$0xff] }
  0xf5   : > { %495 = vperm.xlu0 %788, %v472_v17   ;;  %473 = vst [vmem:[#allocation1] ss:$9 sm:$0xff] %v432_v13 }
  0xf6   : > { %474 = vst [vmem:[#allocation1 + $0x1] ss:$9 sm:$0xff] %v433_v14 }
  0xf7   : > { %475 = vst [vmem:[#allocation1 + $0x2] ss:$9 sm:$0xff] %v434_v15 }
  0xf8   : > { %476 = vst [vmem:[#allocation1 + $0x3] ss:$9 sm:$0xff] %v435_v16  ;;  %v791_v16 = vld [vmem:[%s1109_s4] ss:$0 sm:$0xff] }
  0xf9   : > { %477 = vst [vmem:[#allocation1 + $0x4] ss:$9 sm:$0xff] %v436_v18 }
  0xfa   : > { %478 = vst [vmem:[#allocation1 + $0x5] ss:$9 sm:$0xff] %v437_v19 }
  0xfb   : > { %479 = vst [vmem:[#allocation1 + $0x6] ss:$9 sm:$0xff] %v438_v20 }
  0xfc   : > { %480 = vst [vmem:[#allocation1 + $0x7] ss:$9 sm:$0xff] %v439_v21 }
 0x103   : > { %v481_v27 = vld [vmem:[#allocation1] sm:$0xff] }
 0x104   : > { %498 = vperm.xlu1 %789, %v481_v27   ;;  %482 = vst [vmem:[#allocation1] ss:$9 sm:$0xff] %v440_v23 }
 0x105   : > { %483 = vst [vmem:[#allocation1 + $0x1] ss:$9 sm:$0xff] %v441_v24 }
 0x106   : > { %484 = vst [vmem:[#allocation1 + $0x2] ss:$9 sm:$0xff] %v442_v25 }
 0x107   : > { %485 = vst [vmem:[#allocation1 + $0x3] ss:$9 sm:$0xff] %v443_v26 }
 0x108   : > { %486 = vst [vmem:[#allocation1 + $0x4] ss:$9 sm:$0xff] %v444_v28 }
 0x109   : > { %487 = vst [vmem:[#allocation1 + $0x5] ss:$9 sm:$0xff] %v445_v29 }
 0x10a   : > { %488 = vst [vmem:[#allocation1 + $0x6] ss:$9 sm:$0xff] %v446_v30 }
 0x10b   : > { %489 = vst [vmem:[#allocation1 + $0x7] ss:$9 sm:$0xff] %v447_v31 }
 0x10c   : > { %378 = vperm.xlu1 %789, %v1031_v60  }
 0x112   : > { %v490_v32 = vld [vmem:[#allocation1] sm:$0xff] }
 0x113   : > { %501 = vperm.xlu2 %787, %v490_v32  }
 0x11b   : > { %375 = vperm.xlu2 %787, %v1029_v50  }
 0x12b   : > { %v373_v43 = vpop.permute.xlu1 %372 }
 0x12c   : > { %v384_v62 = vperm.slane %v373_v43, %v383_v46 }
 0x140   : > { %v493_v34 = vpop.permute.xlu2 %492 }
 0x141   : > { %v503_v50 = vperm.slane %v493_v34, %v381_v42 }
 0x148   : > { %v370_v39 = vpop.permute.xlu2 %369 }
 0x149   : > { %v382_v59 = vperm.slane %v370_v39, %v381_v42 }
 0x14b   : > { %v386_v0 = vsel %vm385_vm1, %v384_v62, %v382_v59 }
 0x167   : > { %v496_v45 = vpop.permute.xlu0 %495 }
 0x168   : > { %v504_v48 = vperm.slane %v496_v45, %v383_v46 }
 0x16a   : > { %v505_v54 = vsel %vm385_vm1, %v504_v48, %v503_v50 }
 0x16d   : > { %v502_v44 = vpop.permute.xlu2 %501 }
 0x16e   : > { %v508_v53 = vperm.slane %v502_v44, %v391_v47 }
 0x175   : > { %v376_v56 = vpop.permute.xlu2 %375 }
 0x176   : > { %v499_v51 = vpop.permute.xlu1 %498  ;;  %v388_v61 = vperm.slane %v376_v56, %v387_v49 }
 0x177   : > { %v506_v52 = vperm.slane %v499_v51, %v387_v49 }
 0x178   : > { %v390_v3 = vsel %vm389_vm3, %v388_v61, %v386_v0 }
 0x179   : > { %v507_v57 = vsel %vm389_vm3, %v506_v52, %v505_v54 }
 0x17a   : > { %v509_v58 = vsel %vm393_vm2, %v508_v53, %v507_v57 }
 0x17b   : > { %v511_v60 = vadd.f32 %v509_v58, %v399_v55 }
 0x17d   : > { %512 = vst.msk [vmem:[#allocation3] sm:$0x1] %vm265_vm0, %v511_v60 }
 0x17e   : > { %v379_v63 = vpop.permute.xlu1 %378 }
 0x17f   : > { %v392_v2 = vperm.slane %v379_v63, %v391_v47 }
 0x181   : > { %v394_v4 = vsel %vm393_vm2, %v392_v2, %v390_v3 }
 0x182   : > { %v396_v5 = vmax.f32 %v276_v1, %v394_v4 }
 0x184   : > { %398 = vst.msk [vmem:[#allocation2] sm:$0x1] %vm265_vm0, %v396_v5  ;;  %v517_v6 = vld [vmem:[#allocation3] sm:$0x1] }
 0x185   : > { %v518_v7 = vmul.f32 0.00390625, %v517_v6 }
 0x187   : > { %v520_v8 = vperm.slane %v518_v7, 0 }
 0x18b   : > { %v516_v9 = vld [vmem:[#allocation2] sm:$0x1] }
 0x18c   : > { %v523_v10 = vsel %vm522_vm4, %v516_v9, %v520_v8 }
 0x18d   : > { %713 = vmatmul.msk.f32.vlgmr.msra.gmra.mxu0 %vm532_vm5, %v523_v10 }
 0x20a   : > { %v553_v13 = vpop.f32.mrf.mxu0 }
 0x20b   : > { %v554_v14 = vadd.f32 %v790_v12, %v553_v13 }
 0x20d   : > { %v556_v15 = vmax.f32 %v554_v14, 0.0 }
 0x20f   : > { %715 = vmatmul.msk.f32.vlgmr.msra.gmra.mxu1 %vm562_vm7, %v556_v15 }
 0x28c   : > { %v587_v17 = vpop.f32.mrf.mxu1 }
 0x28d   : > { %v588_v18 = vadd.f32 %v791_v16, %v587_v17 }
 0x28f   : > { %v591_v19 = vrot.slane %v588_v18, 1 }
 0x291   : > { %v593_v20 = vadd.f32 %v591_v19, %v588_v18 }
 0x293   : > { %v716_v21 = vmul.f32 -1.442695, %v593_v20 }
 0x295   : > { %792 = vpow2.f32 %v716_v21 }
 0x29b   : > { %v793_v22 = vpop.eup %792 }
 0x29c   : > { %v597_v23 = vadd.f32 1.0, %v793_v22 }
 0x29e   : > { %794 = vrcp.f32 %v597_v23  ;;  %v609_v27 = vand.u32 2147483648, %v597_v23  ;;  %v607_v29 = vand.u32 2147483647, %v597_v23  ;;  %vm603_vm9 = vweird.f32 %v597_v23 }
 0x2a0   : > { %v610_v31 = vor.u32 1.1754944e-38, %v609_v27  ;;  %vm608_vm11 = vcmp.eq.f32.partialorder %v607_v29, 8.507059e+37 }
 0x2a4   : > { %v795_v24 = vpop.eup %794 }
 0x2a5   : > { %v599_v25 = vmul.f32 %v795_v24, %v597_v23  ;;  %vm604_vm8 = vweird.f32 %v795_v24 }
 0x2a6   : > { %vm605_vm10 = vmor %vm603_vm9, %vm604_vm8 }
 0x2a7   : > { %v600_v26 = vsub.f32 1.0, %v599_v25 }
 0x2a9   : > { %v601_v28 = vmul.f32 %v795_v24, %v600_v26 }
 0x2ab   : > { %v602_v30 = vadd.f32 %v795_v24, %v601_v28 }
 0x2ad   : > { %v606_v32 = vsel %vm605_vm10, %v795_v24, %v602_v30 }
 0x2ae   : > { %v611_v33 = vsel %vm608_vm11, %v610_v31, %v606_v32 }
 0x2af   : > { %613 = vst.msk [vmem:[%s259_s13] sm:$0x1] %vm265_vm0, %v611_v33 }
 0x2b0   : > { %853 = shalt.err (!%p850_p13)
}
 0x2b1   : > { %722 = dma.vmem_to_hbm [thread:$0]  (%p996_p9), %s626_s14, 16, %s628_s15, %s615_s21  }
 0x2b2 PF: > { %s639_s29 = sand.u32 1, %s888_s18   ;;  %p729_p0 = pnand %p707_p12, %p1003_p11 }
 0x2b3   : > { %s640_s12 = scalar_lea.sflag [#allocation6], %s639_s29 }
 0x2b4   : > { %p730_p1 = pneg %p729_p0 }
 0x2b6   : > { %883 = dma.done.wait (%p730_p1), %s640_s12, 16  }
 0x2b7   : > { %885 = vsyncadd (%p730_p1), %s640_s12, 4294967280  ;;  %s21_s23 = sadd.s32 1, %s908_s23   ;;  %s1115_s18 = smov %s892_s19 }
 0x2b8   : > { %p18_p2 = scmp.ge.s32.totalorder %s21_s23, 4   ;;  %s1116_s19 = smov %s896_s20 }
 0x2b9   : > { %s1117_s20 = smov %s1001_s7  ;;  %s1118_s21 = smov %s904_s22 }
 0x2ba   : > { %s1119_s22 = smov %s1121_s26  ;;  %20 = sbr.rel (!%p18_p2) target bundleno = 6 (0x6), region = 107 }
 0x2bf   :  { %645 = vsyncpa [#allocation5], 1 }
 0x2c0   :  { %647 = vsyncpa [#allocation5 + $0x1], 1 }
 0x2c1   :  { %648 = vsyncpa [#allocation6], 1 }
 0x2c2   :  { %650 = vsyncpa [#allocation6 + $0x1], 1 }

</bundles_post_ra>
